<compile_context>
chip_gen: v7x
topology: tpu7x:2x2x1
jax: 0.10.0
libtpu: 0.0.40
codegen_flags: <defaults>
</compile_context>

<pallas_src>
from functools import partial

import jax
import jax.numpy as jnp
from jax.experimental import pallas as pl
from jax.experimental.pallas import tpu as pltpu


def _round_up(n, m):
    return ((n + m - 1) // m) * m


def _num_tensorcores():
    # Megacore chips (2 TensorCores per chip): v4, v5p, v7x.
    try:
        kind = jax.devices()[0].device_kind.lower()
    except Exception:
        return 1
    return 2 if any(t in kind for t in ("v7", "v5p", "v4")) else 1


_NUM_TC = _num_tensorcores()


def policy_mlp_kernel(x_ref, w1_ref, b1_ref, w2_ref, b2_ref, o_ref):
    # x_ref:  (TB, S) f32   w1_ref: (S, H) f32   b1_ref: (1, H) f32
    # w2_ref: (H, A) f32    b2_ref: (1, A) f32   o_ref:  (TB, A) f32
    x = x_ref[...]
    s = x_ref.shape[1]

    # Layer 1 on the VPU: tiny K = S contraction as S broadcast FMAs, all f32
    # (avoids a K=4 MXU pass / possible relayout and keeps layer-1 numerics f32).
    h = b1_ref[...]                                  # (1, H) -> broadcasts up
    for k in range(s):                               # S is small & static
        h = h + x[:, k:k + 1] * w1_ref[k:k + 1, :]   # (TB,1)*(1,H) -> (TB,H)
    a = jnp.maximum(h, 0.0)

    # Layer 2 on the MXU: (TB, H) x (H, A), f32 accumulation, compact output.
    out = jnp.dot(a, w2_ref[...], preferred_element_type=jnp.float32) + b2_ref[...]
    o_ref[...] = out.astype(o_ref.dtype)


@partial(jax.jit, static_argnames=("tb",))
def policy_network_forward(x, w1, b1, w2, b2, *, tb=4096):
    """x: (B, S) f32.  w1: (S, H), b1: (H,)|(1,H), w2: (H, A), b2: (A,)|(1,A).

    Returns (B, A) f32 = relu(x @ w1 + b1) @ w2 + b2.
    """
    B, S = x.shape
    H = w1.shape[1]
    A = w2.shape[1]

    tb = max(8, _round_up(int(tb), 8))               # validate user tile size

    # Balanced batch tiles, TB a multiple of 8 sublanes; no explicit padding —
    # the last grid step may be a partial block.
    n_steps = max(1, -(-B // tb))                    # cdiv
    if _NUM_TC > 1 and n_steps < _NUM_TC and B >= 8 * _NUM_TC:
        n_steps = _NUM_TC                            # keep both TCs busy (megacore)
    TB = _round_up(-(-B // n_steps), 8)
    TB = max(8, min(TB, _round_up(B, 8)))
    grid = (pl.cdiv(B, TB),)

    x_f = x.astype(jnp.float32)
    w1_f = w1.astype(jnp.float32)
    b1_f = b1.reshape(1, H).astype(jnp.float32)
    w2_f = w2.astype(jnp.float32)
    b2_f = b2.reshape(1, A).astype(jnp.float32)

    return pl.pallas_call(
        policy_mlp_kernel,
        out_shape=jax.ShapeDtypeStruct((B, A), jnp.float32),
        grid=grid,
        in_specs=[
            pl.BlockSpec((TB, S), lambda i: (i, 0)),     # x   (streamed)
            pl.BlockSpec((S, H), lambda i: (0, 0)),      # w1  (VMEM-resident)
            pl.BlockSpec((1, H), lambda i: (0, 0)),      # b1  (VMEM-resident)
            pl.BlockSpec((H, A), lambda i: (0, 0)),      # w2  (VMEM-resident)
            pl.BlockSpec((1, A), lambda i: (0, 0)),      # b2  (VMEM-resident)
        ],
        out_specs=pl.BlockSpec((TB, A), lambda i: (i, 0)),
        compiler_params=pltpu.CompilerParams(
            dimension_semantics=("parallel",),           # megacore split on 2-TC chips
        ),
    )(x_f, w1_f, b1_f, w2_f, b2_f)


def init_params(key, state_size=4, action_size=2, num_hidden=128):
    # Deterministic init mimicking nn.Linear's uniform(-1/sqrt(fan_in), +1/sqrt(fan_in)),
    # with weights stored transposed: W is (in_features, out_features).
    k1, k2, k3, k4 = jax.random.split(key, 4)
    lim1 = 1.0 / jnp.sqrt(jnp.float32(state_size))
    lim2 = 1.0 / jnp.sqrt(jnp.float32(num_hidden))
    w1 = jax.random.uniform(k1, (state_size, num_hidden), jnp.float32, -lim1, lim1)
    b1 = jax.random.uniform(k2, (1, num_hidden), jnp.float32, -lim1, lim1)
    w2 = jax.random.uniform(k3, (num_hidden, action_size), jnp.float32, -lim2, lim2)
    b2 = jax.random.uniform(k4, (1, action_size), jnp.float32, -lim2, lim2)
    return w1, b1, w2, b2


def _reference(x, w1, b1, w2, b2):
    # Plain f32 reference matching the PyTorch module.
    h = jnp.dot(x, w1, precision=jax.lax.Precision.HIGHEST) + b1.reshape(1, -1)
    a = jnp.maximum(h, 0.0)
    return jnp.dot(a, w2, precision=jax.lax.Precision.HIGHEST) + b2.reshape(1, -1)


if __name__ == "__main__":
    state_size, action_size, num_hidden = 4, 2, 128

    key = jax.random.PRNGKey(0)
    kx, kp, kx2 = jax.random.split(key, 3)
    w1, b1, w2, b2 = init_params(kp, state_size, action_size, num_hidden)

    # Small batch: exercises a single partial block (B=2 < TB=8, rows masked on writeback).
    batch = 2
    x = jax.random.normal(kx, (batch, state_size), jnp.float32)
    out = jax.block_until_ready(policy_network_forward(x, w1, b1, w2, b2))
    ref = _reference(x, w1, b1, w2, b2)
    assert out.shape == (batch, action_size)
    assert jnp.allclose(out, ref, atol=2e-2, rtol=2e-2)

    # Larger batch: balanced tiles, partial last block on megacore chips, no padding copies.
    batch2 = 600
    x2 = jax.random.normal(kx2, (batch2, state_size), jnp.float32)
    out2 = jax.block_until_ready(policy_network_forward(x2, w1, b1, w2, b2))
    ref2 = _reference(x2, w1, b1, w2, b2)
    assert out2.shape == (batch2, action_size)
    assert jnp.allclose(out2, ref2, atol=2e-2, rtol=2e-2)

    print("KERNEL_OK")
</pallas_src>

<mosaic_0001>
module attributes {stable_mosaic.version = 11 : i64} {
  func.func @policy_mlp_kernel(%arg0: i32, %arg1: memref<8x4xf32, #tpu.memory_space<vmem>>, %arg2: memref<4x128xf32, #tpu.memory_space<vmem>>, %arg3: memref<1x128xf32, #tpu.memory_space<vmem>>, %arg4: memref<128x2xf32, #tpu.memory_space<vmem>>, %arg5: memref<1x2xf32, #tpu.memory_space<vmem>>, %arg6: memref<8x2xf32, #tpu.memory_space<vmem>>) attributes {dimension_semantics = [#tpu.dimension_semantics<parallel>], iteration_bounds = array<i64: 1>, scalar_prefetch = 0 : i64, scratch_operands = 0 : i64, tpu.core_type = #tpu.core_type<tc>, window_params = [{transform_indices = @transform_0, window_bounds = array<i64: 8, 4>}, {pipeline_mode = #tpu.pipeline_mode<synchronous>, transform_indices = @transform_1, window_bounds = array<i64: 4, 128>}, {pipeline_mode = #tpu.pipeline_mode<synchronous>, transform_indices = @transform_2, window_bounds = array<i64: 1, 128>}, {pipeline_mode = #tpu.pipeline_mode<synchronous>, transform_indices = @transform_3, window_bounds = array<i64: 128, 2>}, {pipeline_mode = #tpu.pipeline_mode<synchronous>, transform_indices = @transform_4, window_bounds = array<i64: 1, 2>}, {transform_indices = @transform_5, window_bounds = array<i64: 8, 2>}]} {
    %c0 = arith.constant 0 : index
    %c0_0 = arith.constant 0 : index
    %0 = vector.load %arg1[%c0, %c0_0] : memref<8x4xf32, #tpu.memory_space<vmem>>, vector<8x4xf32>
    %c0_1 = arith.constant 0 : index
    %c0_2 = arith.constant 0 : index
    %1 = vector.load %arg3[%c0_1, %c0_2] : memref<1x128xf32, #tpu.memory_space<vmem>>, vector<1x128xf32>
    %2 = vector.extract_strided_slice %0 {offsets = [0, 0], sizes = [8, 1], strides = [1, 1]} : vector<8x4xf32> to vector<8x1xf32>
    %c0_3 = arith.constant 0 : index
    %c0_4 = arith.constant 0 : index
    %3 = vector.load %arg2[%c0_3, %c0_4] : memref<4x128xf32, #tpu.memory_space<vmem>>, vector<1x128xf32>
    %4 = vector.broadcast %2 : vector<8x1xf32> to vector<8x128xf32>
    %5 = vector.broadcast %3 : vector<1x128xf32> to vector<8x128xf32>
    %6 = arith.mulf %4, %5 : vector<8x128xf32>
    %7 = vector.broadcast %1 : vector<1x128xf32> to vector<8x128xf32>
    %8 = arith.addf %7, %6 : vector<8x128xf32>
    %9 = vector.extract_strided_slice %0 {offsets = [0, 1], sizes = [8, 1], strides = [1, 1]} : vector<8x4xf32> to vector<8x1xf32>
    %c1 = arith.constant 1 : index
    %c0_5 = arith.constant 0 : index
    %10 = vector.load %arg2[%c1, %c0_5] : memref<4x128xf32, #tpu.memory_space<vmem>>, vector<1x128xf32>
    %11 = vector.broadcast %9 : vector<8x1xf32> to vector<8x128xf32>
    %12 = vector.broadcast %10 : vector<1x128xf32> to vector<8x128xf32>
    %13 = arith.mulf %11, %12 : vector<8x128xf32>
    %14 = arith.addf %8, %13 : vector<8x128xf32>
    %15 = vector.extract_strided_slice %0 {offsets = [0, 2], sizes = [8, 1], strides = [1, 1]} : vector<8x4xf32> to vector<8x1xf32>
    %c2 = arith.constant 2 : index
    %c0_6 = arith.constant 0 : index
    %16 = vector.load %arg2[%c2, %c0_6] : memref<4x128xf32, #tpu.memory_space<vmem>>, vector<1x128xf32>
    %17 = vector.broadcast %15 : vector<8x1xf32> to vector<8x128xf32>
    %18 = vector.broadcast %16 : vector<1x128xf32> to vector<8x128xf32>
    %19 = arith.mulf %17, %18 : vector<8x128xf32>
    %20 = arith.addf %14, %19 : vector<8x128xf32>
    %21 = vector.extract_strided_slice %0 {offsets = [0, 3], sizes = [8, 1], strides = [1, 1]} : vector<8x4xf32> to vector<8x1xf32>
    %c3 = arith.constant 3 : index
    %c0_7 = arith.constant 0 : index
    %22 = vector.load %arg2[%c3, %c0_7] : memref<4x128xf32, #tpu.memory_space<vmem>>, vector<1x128xf32>
    %23 = vector.broadcast %21 : vector<8x1xf32> to vector<8x128xf32>
    %24 = vector.broadcast %22 : vector<1x128xf32> to vector<8x128xf32>
    %25 = arith.mulf %23, %24 : vector<8x128xf32>
    %26 = arith.addf %20, %25 : vector<8x128xf32>
    %cst = arith.constant 0.000000e+00 : f32
    %27 = vector.broadcast %cst : f32 to vector<8x128xf32>
    %28 = arith.maximumf %26, %27 : vector<8x128xf32>
    %c0_8 = arith.constant 0 : index
    %c0_9 = arith.constant 0 : index
    %29 = vector.load %arg4[%c0_8, %c0_9] : memref<128x2xf32, #tpu.memory_space<vmem>>, vector<128x2xf32>
    %cst_10 = arith.constant dense<0.000000e+00> : vector<8x2xf32>
    %30 = tpu.matmul %28, %29, %cst_10 {dimension_numbers = #tpu.dot_dimension_numbers<[1], [0], [0], [1], [0, 0, 1, 1], [], []>} : vector<8x128xf32>, vector<128x2xf32>, vector<8x2xf32> -> vector<8x2xf32>
    %c0_11 = arith.constant 0 : index
    %c0_12 = arith.constant 0 : index
    %31 = vector.load %arg5[%c0_11, %c0_12] : memref<1x2xf32, #tpu.memory_space<vmem>>, vector<1x2xf32>
    %32 = vector.broadcast %31 : vector<1x2xf32> to vector<8x2xf32>
    %33 = arith.addf %30, %32 : vector<8x2xf32>
    %c0_13 = arith.constant 0 : index
    %c0_14 = arith.constant 0 : index
    %34 = vector.load %arg6[%c0_13, %c0_14] : memref<8x2xf32, #tpu.memory_space<vmem>>, vector<8x2xf32>
    tpu.vector_store %arg6[%c0_13, %c0_14], %33 {strides = array<i32>} : memref<8x2xf32, #tpu.memory_space<vmem>>, vector<8x2xf32>,
    return
  }
  func.func @transform_0(%arg0: i32) -> (i32, i32) {
    %c0_i32 = arith.constant 0 : i32
    %c0_i32_0 = arith.constant 0 : i32
    return %arg0, %c0_i32 : i32, i32
  }
  func.func @transform_1(%arg0: i32) -> (i32, i32) {
    %c0_i32 = arith.constant 0 : i32
    %c0_i32_0 = arith.constant 0 : i32
    %c0_i32_1 = arith.constant 0 : i32
    return %c0_i32, %c0_i32_0 : i32, i32
  }
  func.func @transform_2(%arg0: i32) -> (i32, i32) {
    %c0_i32 = arith.constant 0 : i32
    %c0_i32_0 = arith.constant 0 : i32
    %c0_i32_1 = arith.constant 0 : i32
    return %c0_i32, %c0_i32_0 : i32, i32
  }
  func.func @transform_3(%arg0: i32) -> (i32, i32) {
    %c0_i32 = arith.constant 0 : i32
    %c0_i32_0 = arith.constant 0 : i32
    %c0_i32_1 = arith.constant 0 : i32
    return %c0_i32, %c0_i32_0 : i32, i32
  }
  func.func @transform_4(%arg0: i32) -> (i32, i32) {
    %c0_i32 = arith.constant 0 : i32
    %c0_i32_0 = arith.constant 0 : i32
    %c0_i32_1 = arith.constant 0 : i32
    return %c0_i32, %c0_i32_0 : i32, i32
  }
  func.func @transform_5(%arg0: i32) -> (i32, i32) {
    %c0_i32 = arith.constant 0 : i32
    %c0_i32_0 = arith.constant 0 : i32
    return %arg0, %c0_i32 : i32, i32
  }
}

</mosaic_0001>

<bundles_post_ra>
// kernel: policy_network_forward.1
= control target key start
LH: loop header
LB: loop body
LE: loop exit
PB: predicated region body
PF: predicated region fallthrough
CT: control target
= control target key end

     0   :  { %v307_v2 = vmov 0   ;;  %v308_v3 = vmov 2   ;;  %s428_s0 = inlined_call_operand.vmem [shape: f32[2,4], index: 0, kind: input, shape index: {}]   ;;  %s429_s1 = inlined_call_operand.vmem [shape: f32[4,128], index: 1, kind: input, shape index: {}]   ;;  %s430_s2 = inlined_call_operand.vmem [shape: f32[1,128], index: 2, kind: input, shape index: {}]   ;;  %s431_s3 = inlined_call_operand.vmem [shape: f32[128,2], index: 3, kind: input, shape index: {}]   ;;  %s432_s4 = inlined_call_operand.vmem [shape: f32[1,2], index: 4, kind: input, shape index: {}]   ;;  %s433_s5 = inlined_call_operand.hbm [shape: f32[2,2], index: 5, kind: output, shape index: {}]  }
   0x1   :  { %v21_v0 = vld [vmem:[%s428_s0] sm:$0xff]  ;;  %278 = vset.pattern.permute.xlu0 %v307_v2  ;;  %280 = vset.pattern.permute.xlu1 %v308_v3 }
   0x2   :  { %v75_v1 = vld [vmem:[%s431_s3] sm:$0xff] }
   0x3   :  { %10 = vsyncpa [#allocation3], 0  ;;  %v76_v4 = vld [vmem:[%s431_s3 + $0x8] sm:$0xff]  ;;  %v77_v5 = vld [vmem:[%s431_s3 + $0x10] sm:$0xff]  ;;  %26 = vperm.xlu0 %278, %v21_v0   ;;  %54 = vperm.xlu1 %280, %v21_v0   ;;  %v309_v8 = vmov 0.0|0.0   ;;  %v310_v12 = vmov 1  }
   0x4   :  { %v245_v6 = vpack.c.bf16 %v76_v4, %v75_v1  ;;  %v78_v7 = vld [vmem:[%s431_s3 + $0x18] sm:$0xff]  ;;  %244 = vmatprep.subr.bf16.mxu0 %v309_v8  ;;  %v79_v10 = vld [vmem:[%s431_s3 + $0x20] sm:$0xff]  ;;  %v80_v11 = vld [vmem:[%s431_s3 + $0x28] sm:$0xff]  ;;  %v311_v13 = vmov 3   ;;  %vm312_vm0 = vmmov 0   ;;  %v313_v21 = vmov 0.0  }
   0x5   :  { %v248_v9 = vpack.c.bf16 %v78_v7, %v77_v5  ;;  %v251_v14 = vpack.c.bf16 %v80_v11, %v79_v10  ;;  %v81_v15 = vld [vmem:[%s431_s3 + $0x30] sm:$0xff]  ;;  %v82_v16 = vld [vmem:[%s431_s3 + $0x38] sm:$0xff]  ;;  %v83_v18 = vld [vmem:[%s431_s3 + $0x40] sm:$0xff]  ;;  %241 = vmatprep.mubr.msk.f32.mxu0 %vm312_vm0, %v313_v21  ;;  %vm168_vm1 = vcmask 15360  }
   0x6   :  { %246 = vmatpush3.bf16.msra.mxu0 %v245_v6  ;;  %v254_v17 = vpack.c.bf16 %v82_v16, %v81_v15  ;;  %v84_v19 = vld [vmem:[%s431_s3 + $0x48] sm:$0xff]  ;;  %v85_v22 = vld [vmem:[%s431_s3 + $0x50] sm:$0xff]  ;;  %v86_v23 = vld [vmem:[%s431_s3 + $0x58] sm:$0xff] }
   0x7   :  { %247 = vmatprep.subr.bf16.mxu0 %v309_v8  ;;  %279 = vset.pattern.permute.xlu0 %v310_v12  ;;  %v257_v20 = vpack.c.bf16 %v84_v19, %v83_v18  ;;  %v260_v24 = vpack.c.bf16 %v86_v23, %v85_v22  ;;  %v87_v25 = vld [vmem:[%s431_s3 + $0x60] sm:$0xff]  ;;  %v88_v26 = vld [vmem:[%s431_s3 + $0x68] sm:$0xff]  ;;  %v89_v28 = vld [vmem:[%s431_s3 + $0x70] sm:$0xff] }
   0x8   :  { %281 = vset.pattern.permute.xlu1 %v311_v13  ;;  %43 = vperm.xlu0 %279, %v21_v0   ;;  %v263_v27 = vpack.c.bf16 %v88_v26, %v87_v25  ;;  %v90_v29 = vld [vmem:[%s431_s3 + $0x78] sm:$0xff]  ;;  %v186_v31 = vld [vmem:[%s429_s1] ss:$0 sm:$0xff]  ;;  %v188_v36 = vld [vmem:[%s429_s1 + $0x1] ss:$0 sm:$0xff] }
   0x9   :  { %65 = vperm.xlu1 %281, %v21_v0   ;;  %v266_v30 = vpack.c.bf16 %v90_v29, %v89_v28  ;;  %v187_v35 = vld [vmem:[%s430_s2] ss:$0 sm:$0xff]  ;;  %v189_v37 = vld [vmem:[%s429_s1 + $0x2] ss:$0 sm:$0xff]  ;;  %v190_v39 = vld [vmem:[%s429_s1 + $0x3] ss:$0 sm:$0xff] }
   0xa   :  { %249 = vmatpush3.bf16.msra.mxu0 %v248_v9  ;;  %v191_v49 = vld [vmem:[%s432_s4] ss:$0 sm:$0xff] }
   0xb   :  { %250 = vmatprep.subr.bf16.mxu0 %v309_v8 }
   0xc   :  { %282 = vset.pattern.permute.xlu0 %v311_v13 }
   0xe   :  { %252 = vmatpush3.bf16.msra.mxu0 %v251_v14 }
   0xf   :  { %253 = vmatprep.subr.bf16.mxu0 %v309_v8 }
  0x12   :  { %255 = vmatpush3.bf16.msra.mxu0 %v254_v17 }
  0x13   :  { %256 = vmatprep.subr.bf16.mxu0 %v309_v8 }
  0x16   :  { %258 = vmatpush3.bf16.msra.mxu0 %v257_v20 }
  0x17   :  { %259 = vmatprep.subr.bf16.mxu0 %v309_v8 }
  0x1a   :  { %261 = vmatpush3.bf16.msra.mxu0 %v260_v24 }
  0x1b   :  { %262 = vmatprep.subr.bf16.mxu0 %v309_v8 }
  0x1e   :  { %264 = vmatpush3.bf16.msra.mxu0 %v263_v27 }
  0x1f   :  { %265 = vmatprep.subr.bf16.mxu0 %v309_v8 }
  0x22   :  { %267 = vmatpush3.bf16.msra.mxu0 %v266_v30 }
  0x82   :  { %v27_v32 = vpop.permute.xlu0 %26  ;;  %v55_v33 = vpop.permute.xlu1 %54 }
  0x83   :  { %v33_v34 = vmul.f32 %v186_v31, %v27_v32  ;;  %v61_v43 = vmul.f32 %v189_v37, %v55_v33 }
  0x85   :  { %v40_v41 = vadd.f32 %v187_v35, %v33_v34 }
  0x87   :  { %v44_v38 = vpop.permute.xlu0 %43 }
  0x88   :  { %v66_v40 = vpop.permute.xlu1 %65  ;;  %v50_v42 = vmul.f32 %v188_v36, %v44_v38 }
  0x89   :  { %v72_v45 = vmul.f32 %v190_v39, %v66_v40 }
  0x8a   :  { %v51_v44 = vadd.f32 %v50_v42, %v40_v41 }
  0x8c   :  { %v62_v46 = vadd.f32 %v61_v43, %v51_v44 }
  0x8e   :  { %v73_v47 = vadd.f32 %v72_v45, %v62_v46 }
  0x90   :  { %v74_v48 = vmax.f32 %v73_v47, 0.0 }
  0x92   :  { %242 = vmatmul.mubr.f32.vlgmr.msra.gmra.mrb[0].mxu0 %v74_v48 }
 0x165   :  { %v164_v50 = vpop.f32.mrb[0].mxu0 }
 0x166   :  { %v165_v51 = vadd.f32 %v191_v49, %v164_v50  ;;  %v243_v52 = vpop.f32.mrb[1].mxu0 }
 0x168   :  { %169 = vst.msk [vmem:[#allocation2] sm:$0xff] %vm168_vm1, %v165_v51 }
 0x169   :  { %174 = vsyncadd [#allocation3], 96  ;;  %s314_s1 = smov [#allocation2]  }
 0x16a   :  { %s175_s10 = sshll.u32 %s314_s1, 4  ;;  %s176_s10 = int_to_ptr.vmem [resolvable:$true] %s175_s10 }
 0x16b   :  { %s283_s11 = scalar_lea.vmem %s176_s10, 32  ;;  %s287_s12 = scalar_lea.vmem %s176_s10, 128 }
 0x16c   :  { %p284_p0 = scmp.ne.s32.totalorder %s176_s10, %s283_s11  ;;  %p288_p1 = scmp.lt.s32.totalorder %s176_s10, %s176_s10 }
 0x16d   :  { %p289_p2 = scmp.lt.s32.totalorder %s287_s12, %s283_s11 }
 0x16f   :  { %p290_p3 = por %p289_p2, %p288_p1 }
 0x171   :  { %p291_p4 = pnand %p290_p3, %p284_p0 }
 0x173   :  { %294 = shalt.err (!%p291_p4)
}
 0x174   :  { %s295_s4 = scalar_lea.hbm %s433_s5, 32 }
 0x175   :  { %p296_p5 = scmp.ne.s32.totalorder %s433_s5, %s295_s4  ;;  %p299_p6 = scmp.lt.u32.totalorder %s295_s4, %s433_s5 }
 0x177   :  { %p301_p7 = pnand %p299_p6, %p296_p5 }
 0x179   :  { %304 = shalt.err (!%p301_p7)
}
 0x17a   :  { %s315_s19 = smov 32   ;;  %s316_s20 = smov 2  }
 0x17b   :  { %181 = dma.vmem_to_hbm [thread:$0]  %s176_s10, 32, %s433_s5, [#allocation3], %s315_s19, %s315_s19, %s316_s20  }
 0x17c   :  { %305 = dma.done.wait [#allocation3], 128  }
 0x17d   :  { %306 = vsyncadd [#allocation3], 4294967168 }
 0x17e   :  { %185 = vsyncpa [#allocation3], 1 }

</bundles_post_ra>
